<compile_context>
chip_gen: v5e
topology: v5e:2x2
jax: 0.10.0
libtpu: 0.0.40
codegen_flags: <defaults>
</compile_context>

<pallas_src>
import jax
import jax.numpy as jnp
from jax import lax
from jax.experimental import pallas as pl
from jax.experimental.pallas import tpu as pltpu

ALPHA = 0.5
BETA = 25.0
LAMBDA_GAN = 1.0
LAMBDA_SAC = 10.0
EPS = 1e-6  # matches nn.CosineSimilarity(dim=1, eps=1e-06)


def _cdiv(a, b):
    return -(-a // b)


def _round_up(a, b):
    return _cdiv(a, b) * b


def loss_forward(x, y, generated_y, real_features, *, tile_rows=None, n_par=1):
    """Pallas-accelerated LossFunctions.forward."""
    n, c, h, w = x.shape
    hw = h * w

    # --- appearance consistency (sorted MSE) ---
    # TODO(synk): torch.sort has no Pallas TPU primitive; jnp.sort runs in XLA and
    # its subtract-square-mean fuses into the sort epilogue, so only this scalar
    # (not two full sorted tensors) reaches the final combine.
    gy_sorted = jnp.sort(generated_y.reshape(-1).astype(jnp.float32))
    y_sorted = jnp.sort(y.reshape(-1).astype(jnp.float32))
    appearance = jnp.mean((gy_sorted - y_sorted) ** 2)

    # --- lane-dense layouts (reshapes are free; pads only for ragged %128 sizes) ---
    hw_pad = _round_up(hw, 128)
    x3 = x.reshape(n, c, hw)
    gy3 = generated_y.reshape(n, c, hw)
    if hw_pad != hw:
        # Zero pad: padded lanes contribute 0 to every cosine / gy^2 sum.
        x3 = jnp.pad(x3, ((0, 0), (0, 0), (0, hw_pad - hw)))
        gy3 = jnp.pad(gy3, ((0, 0), (0, 0), (0, hw_pad - hw)))
    rows = hw_pad // 128
    x4 = x3.reshape(n, c, rows, 128)      # keep upstream dtype; upcast in-kernel
    gy4 = gy3.reshape(n, c, rows, 128)

    # --- tile selection: ~2 MiB per x/gy block, sublane dim a multiple of 8 ---
    itemsize = x.dtype.itemsize
    if tile_rows is None:
        budget = (2 * 1024 * 1024) // max(n * c * 128 * itemsize, 1)
        tile_rows = max(8, (budget // 8) * 8)
    if tile_rows >= rows or rows < 8:
        t_rows = rows                                   # single block along rows
    else:
        t_rows = _round_up(tile_rows, 8)                # multiple of 8
        t_rows = min(t_rows, (rows // 8) * 8)           # and <= rows
    n_row_blocks = _cdiv(rows, t_rows)
    n_steps = _cdiv(n_row_blocks, n_par)
    total_steps = n_par * n_steps
    max_row_blk = n_row_blocks - 1
    need_row_mask = (total_steps * t_rows != rows)      # ragged / over-provisioned

    # --- real features: lane-dense (rows, 128) slab, spread over the same grid ---
    t_real = real_features.size
    t_real_pad = _round_up(t_real, 128)
    rf = real_features.reshape(-1)
    if t_real_pad != t_real:
        rf = jnp.pad(rf, (0, t_real_pad - t_real))      # zeros; masked in kernel
    r_rows = t_real_pad // 128
    real2 = rf.reshape(r_rows, 128)

    rps = _round_up(_cdiv(r_rows, total_steps), 8)      # rows of real per step
    if rps >= r_rows:
        rps = r_rows                                    # single (full-dim) block
    n_real_blocks = _cdiv(r_rows, rps)
    max_real_blk = n_real_blocks - 1
    need_real_mask = (total_steps * rps * 128 != t_real)

    # --- kernel (closes over static sizes; masks/branches are trace-time) ---
    def kernel(x_ref, gy_ref, r_ref, cos_out, gy2_out, sqr_out):
        p = pl.program_id(0)
        s = pl.program_id(1)
        step = p * n_steps + s                          # global (unclamped) step

        @pl.when(s == 0)
        def _init():
            cos_out[...] = jnp.zeros_like(cos_out)
            gy2_out[...] = jnp.zeros_like(gy2_out)
            sqr_out[...] = jnp.zeros_like(sqr_out)

        # Upcast after the load (inputs may be bf16; v5e has no bf16 VPU math).
        xv = x_ref[...].astype(jnp.float32)             # (n, c, t_rows, 128)
        gv = gy_ref[...].astype(jnp.float32)

        if need_row_mask:
            row_ids = step * t_rows + lax.broadcasted_iota(
                jnp.int32, (t_rows, 128), 0)
            rmask = (row_ids < rows)[None, None]        # (1,1,t_rows,128)
            xv = jnp.where(rmask, xv, 0.0)
            gv = jnp.where(rmask, gv, 0.0)

        # gy^2 computed once: feeds both the cosine denominator and mean(fake^2).
        g2 = gv * gv
        # Channel (dim=1) reductions: C is a leading dim, so these are plain
        # full-vreg VALU adds (no XLU, no MXU at <4% utilization).
        dot = jnp.sum(xv * gv, axis=1)                  # (n, t_rows, 128)
        nx2 = jnp.sum(xv * xv, axis=1)
        ng2 = jnp.sum(g2, axis=1)

        # cos = dot / max(|x|*|gy|, eps) == dot * rsqrt(max(nx2*ng2, eps^2))
        cos = dot * lax.rsqrt(jnp.maximum(nx2 * ng2, EPS * EPS))

        cos_out[...] += cos[None]                       # (1, n, t_rows, 128)
        gy2_out[...] += ng2[None]

        rv = r_ref[...].astype(jnp.float32) - 1.0       # (rps, 128)
        sq = rv * rv
        if need_real_mask:
            idx = (step * rps + lax.broadcasted_iota(jnp.int32, (rps, 128), 0)) * 128 \
                + lax.broadcasted_iota(jnp.int32, (rps, 128), 1)
            sq = jnp.where(idx < t_real, sq, 0.0)
        sqr_out[...] += sq[None]                        # (1, rps, 128)

    # Clamped index maps: steps beyond the last valid block re-load it but are
    # fully masked in-kernel, so they contribute exactly 0.
    def xg_map(p, s):
        return (0, 0, jnp.minimum(p * n_steps + s, max_row_blk), 0)

    def r_map(p, s):
        return (jnp.minimum(p * n_steps + s, max_real_blk), 0)

    part_cos = jax.ShapeDtypeStruct((n_par, n, t_rows, 128), jnp.float32)
    part_gy2 = jax.ShapeDtypeStruct((n_par, n, t_rows, 128), jnp.float32)
    part_sqr = jax.ShapeDtypeStruct((n_par, rps, 128), jnp.float32)

    cos_p, gy2_p, sqr_p = pl.pallas_call(
        kernel,
        out_shape=(part_cos, part_gy2, part_sqr),
        grid_spec=pltpu.PrefetchScalarGridSpec(
            num_scalar_prefetch=0,
            grid=(n_par, n_steps),
            in_specs=[
                pl.BlockSpec((n, c, t_rows, 128), xg_map),
                pl.BlockSpec((n, c, t_rows, 128), xg_map),
                pl.BlockSpec((rps, 128), r_map),
            ],
            # Output blocks double as accumulators: constant index along the
            # "arbitrary" axis -> resident in VMEM; raw partial sums go to HBM
            # once per shard and are reduced in XLA (no in-kernel XLU epilogue).
            out_specs=[
                pl.BlockSpec((1, n, t_rows, 128), lambda p, s: (p, 0, 0, 0)),
                pl.BlockSpec((1, n, t_rows, 128), lambda p, s: (p, 0, 0, 0)),
                pl.BlockSpec((1, rps, 128), lambda p, s: (p, 0, 0)),
            ],
        ),
        compiler_params=pltpu.CompilerParams(
            # On v7x, switch axis 0 to pltpu.CORE_PARALLEL if a profile shows a
            # TensorCore idle with n_par=2.
            dimension_semantics=("parallel", "arbitrary"),
            # Generation-safe: <= 48 MiB keeps headroom on v7x (64 MiB physical);
            # v5e/v6e have 128 MiB.  Working set here is ~12-20 MiB.
            vmem_limit_bytes=48 * 1024 * 1024,
        ),
    )(x4, gy4, real2)

    # Cross-shard / cross-lane combine + O(1) scalar assembly (fused by XLA).
    cos_sum = jnp.sum(cos_p)
    gy2_sum = jnp.sum(gy2_p)
    sqr_sum = jnp.sum(sqr_p)

    structural = 1.0 - cos_sum / (n * hw)               # true element counts
    gan = (sqr_sum / t_real + gy2_sum / (n * c * hw)) * 0.5
    sac = ALPHA * structural + BETA * appearance
    return LAMBDA_GAN * gan + LAMBDA_SAC * sac


def loss_reference(x, y, generated_y, real_features):
    """Pure-JAX reference mirroring the PyTorch module."""
    xf = x.astype(jnp.float32)
    yf = y.astype(jnp.float32)
    gf = generated_y.astype(jnp.float32)
    rf = real_features.astype(jnp.float32)

    dot = jnp.sum(xf * gf, axis=1)
    denom = jnp.maximum(
        jnp.sqrt(jnp.sum(xf * xf, axis=1)) * jnp.sqrt(jnp.sum(gf * gf, axis=1)),
        EPS,
    )
    structural = 1.0 - jnp.mean(dot / denom)

    appearance = jnp.mean((jnp.sort(gf.reshape(-1)) - jnp.sort(yf.reshape(-1))) ** 2)
    gan = (jnp.mean((rf - 1.0) ** 2) + jnp.mean(gf ** 2)) / 2.0
    sac = ALPHA * structural + BETA * appearance
    return LAMBDA_GAN * gan + LAMBDA_SAC * sac


if __name__ == "__main__":
    key = jax.random.PRNGKey(0)
    k1, k2, k3, k4, k5, k6, k7, k8 = jax.random.split(key, 8)

    # Test A: tiny module-default shapes; single block, no masking paths.
    shape_a = (2, 4, 16, 16)  # NCHW
    xa = jax.random.normal(k1, shape_a, jnp.float32)
    ya = jax.random.normal(k2, shape_a, jnp.float32)
    ga = jax.random.normal(k3, shape_a, jnp.float32)
    ra = jax.random.normal(k4, shape_a, jnp.float32)
    out_a = loss_forward(xa, ya, ga, ra)
    ref_a = loss_reference(xa, ya, ga, ra)

    # Test B: multi-step reduction with ragged tails — exercises in-kernel row
    # masking, real-feature masking (different-sized real tensor), block-index
    # clamping and the 2-shard "parallel" axis.
    shape_b = (2, 4, 48, 48)
    xb = jax.random.normal(k5, shape_b, jnp.float32)
    yb = jax.random.normal(k6, shape_b, jnp.float32)
    gb = jax.random.normal(k7, shape_b, jnp.float32)
    rb = jax.random.normal(k8, (2, 1, 30, 30), jnp.float32)
    out_b = loss_forward(xb, yb, gb, rb, tile_rows=8, n_par=2)
    ref_b = loss_reference(xb, yb, gb, rb)

    jax.block_until_ready((out_a, out_b))

    assert jnp.allclose(out_a, ref_a, rtol=1e-5, atol=1e-4), (out_a, ref_a)
    assert jnp.allclose(out_b, ref_b, rtol=1e-5, atol=1e-4), (out_b, ref_b)
    print("KERNEL_OK")
</pallas_src>

<mosaic_0001>
module attributes {stable_mosaic.version = 11 : i64} {
  func.func @kernel(%arg0: i32, %arg1: i32, %arg2: memref<2x4x2x128xf32, #tpu.memory_space<vmem>>, %arg3: memref<2x4x2x128xf32, #tpu.memory_space<vmem>>, %arg4: memref<16x128xf32, #tpu.memory_space<vmem>>, %arg5: memref<1x2x2x128xf32, #tpu.memory_space<vmem>>, %arg6: memref<1x2x2x128xf32, #tpu.memory_space<vmem>>, %arg7: memref<1x16x128xf32, #tpu.memory_space<vmem>>) attributes {dimension_semantics = [#tpu.dimension_semantics<parallel>, #tpu.dimension_semantics<arbitrary>], iteration_bounds = array<i64: 1, 1>, scalar_prefetch = 0 : i64, scratch_operands = 0 : i64, tpu.core_type = #tpu.core_type<tc>, window_params = [{transform_indices = @transform_0, window_bounds = array<i64: 2, 4, 2, 128>}, {transform_indices = @transform_1, window_bounds = array<i64: 2, 4, 2, 128>}, {transform_indices = @transform_2, window_bounds = array<i64: 16, 128>}, {transform_indices = @transform_3, window_bounds = array<i64: 1, 2, 2, 128>}, {transform_indices = @transform_4, window_bounds = array<i64: 1, 2, 2, 128>}, {transform_indices = @transform_5, window_bounds = array<i64: 1, 16, 128>}]} {
    %c0_i32 = arith.constant 0 : i32
    %0 = arith.cmpi eq, %arg1, %c0_i32 : i32
    %1 = arith.extui %0 : i1 to i32
    %c0_i32_0 = arith.constant 0 : i32
    %2 = arith.cmpi ne, %1, %c0_i32_0 : i32
    scf.if %2 {
      %cst_36 = arith.constant 0.000000e+00 : f32
      %32 = vector.broadcast %cst_36 : f32 to vector<1x2x2x128xf32>
      %c0_37 = arith.constant 0 : index
      %c0_38 = arith.constant 0 : index
      %c0_39 = arith.constant 0 : index
      %c0_40 = arith.constant 0 : index
      %33 = vector.load %arg5[%c0_37, %c0_38, %c0_39, %c0_40] : memref<1x2x2x128xf32, #tpu.memory_space<vmem>>, vector<1x2x2x128xf32>
      tpu.vector_store %arg5[%c0_37, %c0_38, %c0_39, %c0_40], %32 {strides = array<i32>} : memref<1x2x2x128xf32, #tpu.memory_space<vmem>>, vector<1x2x2x128xf32>,
      %cst_41 = arith.constant 0.000000e+00 : f32
      %34 = vector.broadcast %cst_41 : f32 to vector<1x2x2x128xf32>
      %c0_42 = arith.constant 0 : index
      %c0_43 = arith.constant 0 : index
      %c0_44 = arith.constant 0 : index
      %c0_45 = arith.constant 0 : index
      %35 = vector.load %arg6[%c0_42, %c0_43, %c0_44, %c0_45] : memref<1x2x2x128xf32, #tpu.memory_space<vmem>>, vector<1x2x2x128xf32>
      tpu.vector_store %arg6[%c0_42, %c0_43, %c0_44, %c0_45], %34 {strides = array<i32>} : memref<1x2x2x128xf32, #tpu.memory_space<vmem>>, vector<1x2x2x128xf32>,
      %cst_46 = arith.constant 0.000000e+00 : f32
      %36 = vector.broadcast %cst_46 : f32 to vector<1x16x128xf32>
      %c0_47 = arith.constant 0 : index
      %c0_48 = arith.constant 0 : index
      %c0_49 = arith.constant 0 : index
      %37 = vector.load %arg7[%c0_47, %c0_48, %c0_49] : memref<1x16x128xf32, #tpu.memory_space<vmem>>, vector<1x16x128xf32>
      tpu.vector_store %arg7[%c0_47, %c0_48, %c0_49], %36 {strides = array<i32>} : memref<1x16x128xf32, #tpu.memory_space<vmem>>, vector<1x16x128xf32>,
    } else {
    }
    %c0 = arith.constant 0 : index
    %c0_1 = arith.constant 0 : index
    %c0_2 = arith.constant 0 : index
    %c0_3 = arith.constant 0 : index
    %3 = vector.load %arg2[%c0, %c0_1, %c0_2, %c0_3] : memref<2x4x2x128xf32, #tpu.memory_space<vmem>>, vector<2x4x2x128xf32>
    %c0_4 = arith.constant 0 : index
    %c0_5 = arith.constant 0 : index
    %c0_6 = arith.constant 0 : index
    %c0_7 = arith.constant 0 : index
    %4 = vector.load %arg3[%c0_4, %c0_5, %c0_6, %c0_7] : memref<2x4x2x128xf32, #tpu.memory_space<vmem>>, vector<2x4x2x128xf32>
    %5 = arith.mulf %4, %4 : vector<2x4x2x128xf32>
    %6 = arith.mulf %3, %4 : vector<2x4x2x128xf32>
    %cst = arith.constant dense<0.000000e+00> : vector<2x2x128xf32>
    %7 = vector.multi_reduction <add>, %6, %cst [1] : vector<2x4x2x128xf32> to vector<2x2x128xf32>
    %8 = arith.mulf %3, %3 : vector<2x4x2x128xf32>
    %cst_8 = arith.constant dense<0.000000e+00> : vector<2x2x128xf32>
    %9 = vector.multi_reduction <add>, %8, %cst_8 [1] : vector<2x4x2x128xf32> to vector<2x2x128xf32>
    %cst_9 = arith.constant dense<0.000000e+00> : vector<2x2x128xf32>
    %10 = vector.multi_reduction <add>, %5, %cst_9 [1] : vector<2x4x2x128xf32> to vector<2x2x128xf32>
    %11 = arith.mulf %9, %10 : vector<2x2x128xf32>
    %cst_10 = arith.constant 9.99999996E-13 : f32
    %12 = vector.broadcast %cst_10 : f32 to vector<2x2x128xf32>
    %13 = arith.maximumf %11, %12 : vector<2x2x128xf32>
    %14 = math.rsqrt %13 : vector<2x2x128xf32>
    %15 = arith.mulf %7, %14 : vector<2x2x128xf32>
    %c0_11 = arith.constant 0 : index
    %c0_12 = arith.constant 0 : index
    %c0_13 = arith.constant 0 : index
    %c0_14 = arith.constant 0 : index
    %16 = vector.load %arg5[%c0_11, %c0_12, %c0_13, %c0_14] : memref<1x2x2x128xf32, #tpu.memory_space<vmem>>, vector<1x2x2x128xf32>
    %17 = vector.shape_cast %15 : vector<2x2x128xf32> to vector<1x2x2x128xf32>
    %18 = arith.addf %16, %17 : vector<1x2x2x128xf32>
    %c0_15 = arith.constant 0 : index
    %c0_16 = arith.constant 0 : index
    %c0_17 = arith.constant 0 : index
    %c0_18 = arith.constant 0 : index
    %19 = vector.load %arg5[%c0_15, %c0_16, %c0_17, %c0_18] : memref<1x2x2x128xf32, #tpu.memory_space<vmem>>, vector<1x2x2x128xf32>
    tpu.vector_store %arg5[%c0_15, %c0_16, %c0_17, %c0_18], %18 {strides = array<i32>} : memref<1x2x2x128xf32, #tpu.memory_space<vmem>>, vector<1x2x2x128xf32>,
    %c0_19 = arith.constant 0 : index
    %c0_20 = arith.constant 0 : index
    %c0_21 = arith.constant 0 : index
    %c0_22 = arith.constant 0 : index
    %20 = vector.load %arg6[%c0_19, %c0_20, %c0_21, %c0_22] : memref<1x2x2x128xf32, #tpu.memory_space<vmem>>, vector<1x2x2x128xf32>
    %21 = vector.shape_cast %10 : vector<2x2x128xf32> to vector<1x2x2x128xf32>
    %22 = arith.addf %20, %21 : vector<1x2x2x128xf32>
    %c0_23 = arith.constant 0 : index
    %c0_24 = arith.constant 0 : index
    %c0_25 = arith.constant 0 : index
    %c0_26 = arith.constant 0 : index
    %23 = vector.load %arg6[%c0_23, %c0_24, %c0_25, %c0_26] : memref<1x2x2x128xf32, #tpu.memory_space<vmem>>, vector<1x2x2x128xf32>
    tpu.vector_store %arg6[%c0_23, %c0_24, %c0_25, %c0_26], %22 {strides = array<i32>} : memref<1x2x2x128xf32, #tpu.memory_space<vmem>>, vector<1x2x2x128xf32>,
    %c0_27 = arith.constant 0 : index
    %c0_28 = arith.constant 0 : index
    %24 = vector.load %arg4[%c0_27, %c0_28] : memref<16x128xf32, #tpu.memory_space<vmem>>, vector<16x128xf32>
    %cst_29 = arith.constant 1.000000e+00 : f32
    %25 = vector.broadcast %cst_29 : f32 to vector<16x128xf32>
    %26 = arith.subf %24, %25 : vector<16x128xf32>
    %27 = arith.mulf %26, %26 : vector<16x128xf32>
    %c0_30 = arith.constant 0 : index
    %c0_31 = arith.constant 0 : index
    %c0_32 = arith.constant 0 : index
    %28 = vector.load %arg7[%c0_30, %c0_31, %c0_32] : memref<1x16x128xf32, #tpu.memory_space<vmem>>, vector<1x16x128xf32>
    %29 = vector.shape_cast %27 : vector<16x128xf32> to vector<1x16x128xf32>
    %30 = arith.addf %28, %29 : vector<1x16x128xf32>
    %c0_33 = arith.constant 0 : index
    %c0_34 = arith.constant 0 : index
    %c0_35 = arith.constant 0 : index
    %31 = vector.load %arg7[%c0_33, %c0_34, %c0_35] : memref<1x16x128xf32, #tpu.memory_space<vmem>>, vector<1x16x128xf32>
    tpu.vector_store %arg7[%c0_33, %c0_34, %c0_35], %30 {strides = array<i32>} : memref<1x16x128xf32, #tpu.memory_space<vmem>>, vector<1x16x128xf32>,
    return
  }
  func.func @transform_0(%arg0: i32, %arg1: i32) -> (i32, i32, i32, i32) {
    %c1_i32 = arith.constant 1 : i32
    %0 = arith.muli %arg0, %c1_i32 : i32
    %1 = arith.addi %0, %arg1 : i32
    %c0_i32 = arith.constant 0 : i32
    %2 = arith.minsi %1, %c0_i32 : i32
    %c0_i32_0 = arith.constant 0 : i32
    %c0_i32_1 = arith.constant 0 : i32
    %c0_i32_2 = arith.constant 0 : i32
    %c0_i32_3 = arith.constant 0 : i32
    return %c0_i32_0, %c0_i32_1, %2, %c0_i32_2 : i32, i32, i32, i32
  }
  func.func @transform_1(%arg0: i32, %arg1: i32) -> (i32, i32, i32, i32) {
    %c1_i32 = arith.constant 1 : i32
    %0 = arith.muli %arg0, %c1_i32 : i32
    %1 = arith.addi %0, %arg1 : i32
    %c0_i32 = arith.constant 0 : i32
    %2 = arith.minsi %1, %c0_i32 : i32
    %c0_i32_0 = arith.constant 0 : i32
    %c0_i32_1 = arith.constant 0 : i32
    %c0_i32_2 = arith.constant 0 : i32
    %c0_i32_3 = arith.constant 0 : i32
    return %c0_i32_0, %c0_i32_1, %2, %c0_i32_2 : i32, i32, i32, i32
  }
  func.func @transform_2(%arg0: i32, %arg1: i32) -> (i32, i32) {
    %c1_i32 = arith.constant 1 : i32
    %0 = arith.muli %arg0, %c1_i32 : i32
    %1 = arith.addi %0, %arg1 : i32
    %c0_i32 = arith.constant 0 : i32
    %2 = arith.minsi %1, %c0_i32 : i32
    %c0_i32_0 = arith.constant 0 : i32
    %c0_i32_1 = arith.constant 0 : i32
    return %2, %c0_i32_0 : i32, i32
  }
  func.func @transform_3(%arg0: i32, %arg1: i32) -> (i32, i32, i32, i32) {
    %c0_i32 = arith.constant 0 : i32
    %c0_i32_0 = arith.constant 0 : i32
    %c0_i32_1 = arith.constant 0 : i32
    %c0_i32_2 = arith.constant 0 : i32
    return %arg0, %c0_i32, %c0_i32_0, %c0_i32_1 : i32, i32, i32, i32
  }
  func.func @transform_4(%arg0: i32, %arg1: i32) -> (i32, i32, i32, i32) {
    %c0_i32 = arith.constant 0 : i32
    %c0_i32_0 = arith.constant 0 : i32
    %c0_i32_1 = arith.constant 0 : i32
    %c0_i32_2 = arith.constant 0 : i32
    return %arg0, %c0_i32, %c0_i32_0, %c0_i32_1 : i32, i32, i32, i32
  }
  func.func @transform_5(%arg0: i32, %arg1: i32) -> (i32, i32, i32) {
    %c0_i32 = arith.constant 0 : i32
    %c0_i32_0 = arith.constant 0 : i32
    %c0_i32_1 = arith.constant 0 : i32
    return %arg0, %c0_i32, %c0_i32_0 : i32, i32, i32
  }
}

</mosaic_0001>

<bundles_post_ra>
// kernel: tpu_custom_call.1
= control target key start
LH: loop header
LB: loop body
LE: loop exit
PB: predicated region body
PF: predicated region fallthrough
CT: control target
= control target key end

     0   :  { %11 = vsyncpa [#allocation3], 0  ;;  %s639_s0 = inlined_call_operand.hbm [shape: f32[2,4,2,128], index: 0, kind: input, shape index: {}]   ;;  %s640_s1 = inlined_call_operand.hbm [shape: f32[2,4,2,128], index: 1, kind: input, shape index: {}]   ;;  %s641_s2 = inlined_call_operand.hbm [shape: f32[16,128], index: 2, kind: input, shape index: {}]   ;;  %s642_s3 = inlined_call_operand.hbm [shape: f32[1,2,2,128], index: 3, kind: output, shape index: {0}]   ;;  %s643_s4 = inlined_call_operand.hbm [shape: f32[1,2,2,128], index: 4, kind: output, shape index: {1}]   ;;  %s644_s5 = inlined_call_operand.hbm [shape: f32[1,16,128], index: 5, kind: output, shape index: {2}]  }
   0x1   :  { %12 = vsyncpa [#allocation6], 0 }
   0x2   :  { %13 = vsyncpa [#allocation4], 0 }
   0x3   :  { %14 = vsyncpa [#allocation10], 0  ;;  %s42_s20 = sshll.u32 %s640_s1, 4  ;;  %s465_s21 = smov [#allocation5]   ;;  %s43_s20 = int_to_ptr.hbm [resolvable:$true] %s42_s20 }
   0x4   :  { %s44_s22 = sshll.u32 %s465_s21, 4  ;;  %s24_s25 = sshll.u32 %s639_s0, 4  ;;  %s45_s22 = int_to_ptr.vmem [resolvable:$true] %s44_s22  ;;  %s25_s25 = int_to_ptr.hbm [resolvable:$true] %s24_s25 }
   0x5   :  { %s466_s26 = smov 32   ;;  %s467_s27 = smov 2  }
   0x6   :  { %50 = dma.hbm_to_vmem [thread:$0]  %s43_s20, 256, %s45_s22, [#allocation6], %s466_s26, %s466_s26, %s467_s27  }
   0x7   :  { %s468_s28 = smov [#allocation2]   ;;  %s61_s1 = sshll.u32 %s641_s2, 4  ;;  %s62_s1 = int_to_ptr.hbm [resolvable:$true] %s61_s1 }
   0x8   :  { %s26_s29 = sshll.u32 %s468_s28, 4  ;;  %s469_s0 = smov [#allocation7]   ;;  %s27_s29 = int_to_ptr.vmem [resolvable:$true] %s26_s29 }
   0x9   :  { %32 = dma.hbm_to_vmem [thread:$0]  %s25_s25, 256, %s27_s29, [#allocation3], %s466_s26, %s466_s26, %s467_s27  }
   0xa   :  { %s63_s7 = sshll.u32 %s469_s0, 4  ;;  %s470_s8 = smov 128   ;;  %s64_s7 = int_to_ptr.vmem [resolvable:$true] %s63_s7 }
   0xb   :  { %s471_s9 = smov 8  }
   0xc   :  { %69 = dma.hbm_to_vmem [thread:$0]  %s62_s1, 256, %s64_s7, [#allocation6], %s470_s8, %s470_s8, %s471_s9  }
   0xd   :  { %457 = dma.done.wait [#allocation3], 256  }
   0xe   :  { %458 = vsyncadd [#allocation3], 4294967040 }
   0xf   :  { %459 = dma.done.wait [#allocation6], 512  }
  0x10   :  { %460 = vsyncadd [#allocation6], 4294966784  ;;  %v472_v0 = vmov 0.0   ;;  %vm134_vm0 = vcmask 1041408   ;;  %v524_v1 = vld [vmem:[#allocation2] sm:$0x3] }
  0x11   :  { %98 = vst [vmem:[#allocation9] sm:$0x3] %v472_v0  ;;  %v526_v2 = vld [vmem:[#allocation2 + $0x2] sm:$0x3]  ;;  %v528_v3 = vld [vmem:[#allocation2 + $0x4] sm:$0x3]  ;;  %v149_v7 = vmul.f32 %v524_v1, %v524_v1 }
  0x12   :  { %96 = vst [vmem:[#allocation8] sm:$0x3] %v472_v0  ;;  %v530_v4 = vld [vmem:[#allocation2 + $0x6] sm:$0x3]  ;;  %v532_v5 = vld [vmem:[#allocation5] sm:$0x3]  ;;  %v150_v8 = vmul.f32 %v526_v2, %v526_v2  ;;  %v151_v9 = vmul.f32 %v528_v3, %v528_v3 }
  0x13   :  { %97 = vst [vmem:[#allocation8 + $0x2] sm:$0x3] %v472_v0  ;;  %v534_v6 = vld [vmem:[#allocation5 + $0x2] sm:$0x3]  ;;  %v542_v10 = vld [vmem:[#allocation5 + $0x4] sm:$0x3]  ;;  %v118_v12 = vmul.f32 %v532_v5, %v532_v5  ;;  %v152_v14 = vmul.f32 %v530_v4, %v530_v4 }
  0x14   :  { %99 = vst [vmem:[#allocation9 + $0x2] sm:$0x3] %v472_v0  ;;  %v544_v11 = vld [vmem:[#allocation5 + $0x6] sm:$0x3]  ;;  %v119_v13 = vmul.f32 %v534_v6, %v534_v6  ;;  %v120_v15 = vmul.f32 %v542_v10, %v542_v10  ;;  %v157_v17 = vsel %vm134_vm0, %v149_v7, 0.0  ;;  %v158_v18 = vsel %vm134_vm0, %v150_v8, 0.0 }
  0x15   :  { %v121_v16 = vmul.f32 %v544_v11, %v544_v11  ;;  %v558_v19 = vld [vmem:[#allocation2 + $0x8] sm:$0x3]  ;;  %v560_v20 = vld [vmem:[#allocation2 + $0xa] sm:$0x3]  ;;  %v159_v21 = vadd.f32 %v158_v18, %v157_v17  ;;  %v160_v22 = vsel %vm134_vm0, %v151_v9, 0.0  ;;  %v162_v23 = vsel %vm134_vm0, %v152_v14, 0.0 }
  0x16   :  { %v171_v24 = vsel %vm134_vm0, %v118_v12, 0.0  ;;  %v565_v25 = vld [vmem:[#allocation2 + $0xc] sm:$0x3]  ;;  %v172_v26 = vsel %vm134_vm0, %v119_v13, 0.0  ;;  %v174_v27 = vsel %vm134_vm0, %v120_v15, 0.0  ;;  %v153_v30 = vmul.f32 %v558_v19, %v558_v19  ;;  %s473_s2 = smov [#allocation9]  }
  0x17   :  { %v176_v28 = vsel %vm134_vm0, %v121_v16, 0.0  ;;  %v570_v29 = vld [vmem:[#allocation2 + $0xe] sm:$0x3]  ;;  %v161_v31 = vadd.f32 %v160_v22, %v159_v21  ;;  %v173_v32 = vadd.f32 %v172_v26, %v171_v24  ;;  %v114_v33 = vld [vmem:[#allocation5 + $0x8] sm:$0x3]  ;;  %v154_v36 = vmul.f32 %v560_v20, %v560_v20  ;;  %s596_s10 = sshll.u32 %s473_s2, 4  ;;  %s253_s10 = int_to_ptr.vmem [resolvable:$true] %s596_s10 }
  0x18   :  { %v115_v34 = vld [vmem:[#allocation5 + $0xa] sm:$0x3]  ;;  %v574_v35 = vld [vmem:[#allocation5 + $0xc] sm:$0x3]  ;;  %v155_v37 = vmul.f32 %v565_v25, %v565_v25  ;;  %v580_v38 = vld [vmem:[#allocation5 + $0xe] sm:$0x3]  ;;  %v122_v39 = vmul.f32 %v114_v33, %v114_v33  ;;  %v156_v42 = vmul.f32 %v570_v29, %v570_v29  ;;  %v126_v7 = vmul.f32 %v532_v5, %v524_v1 }
  0x19   :  { %v123_v40 = vmul.f32 %v115_v34, %v115_v34  ;;  %v124_v41 = vmul.f32 %v574_v35, %v574_v35  ;;  %v163_v43 = vadd.f32 %v162_v23, %v161_v31  ;;  %v175_v44 = vadd.f32 %v174_v27, %v173_v32  ;;  %v217_v47 = vld [vmem:[#allocation9] sm:$0x3]  ;;  %s254_s13 = sshll.u32 %s643_s4, 4  ;;  %v223_v12 = vld [vmem:[#allocation7] sm:$0xff]  ;;  %v224_v13 = vld [vmem:[#allocation7 + $0x8] sm:$0xff]  ;;  %s474_s4 = smov [#allocation11]   ;;  %s255_s13 = int_to_ptr.hbm [resolvable:$true] %s254_s13 }
  0x1a   :  { %v125_v45 = vmul.f32 %v580_v38, %v580_v38  ;;  %v164_v46 = vsel %vm134_vm0, %v153_v30, 0.0  ;;  %v165_v48 = vsel %vm134_vm0, %v154_v36, 0.0  ;;  %v167_v49 = vsel %vm134_vm0, %v155_v37, 0.0  ;;  %s265_s14 = sshll.u32 %s474_s4, 4  ;;  %s267_s17 = sshll.u32 %s644_s5, 4  ;;  %s266_s14 = int_to_ptr.vmem [resolvable:$true] %s265_s14  ;;  %s268_s17 = int_to_ptr.hbm [resolvable:$true] %s267_s17 }
  0x1b   :  { %v178_v50 = vsel %vm134_vm0, %v122_v39, 0.0  ;;  %v177_v51 = vadd.f32 %v176_v28, %v175_v44  ;;  %v166_v52 = vadd.f32 %v165_v48, %v164_v46  ;;  %v179_v53 = vsel %vm134_vm0, %v123_v40, 0.0  ;;  %v218_v0 = vld [vmem:[#allocation9 + $0x2] sm:$0x3]  ;;  %s475_s5 = smov [#allocation8]   ;;  %s241_s21 = sshll.u32 %s642_s3, 4  ;;  %s242_s21 = int_to_ptr.hbm [resolvable:$true] %s241_s21 }
  0x1c   :  { %v181_v54 = vsel %vm134_vm0, %v124_v41, 0.0  ;;  %v169_v55 = vsel %vm134_vm0, %v156_v42, 0.0  ;;  %v180_v56 = vadd.f32 %v179_v53, %v178_v50  ;;  %v183_v60 = vsel %vm134_vm0, %v125_v45, 0.0  ;;  %v211_v45 = vld [vmem:[#allocation8] sm:$0x3]  ;;  %s239_s18 = sshll.u32 %s475_s5, 4  ;;  %s240_s18 = int_to_ptr.vmem [resolvable:$true] %s239_s18 }
  0x1d   :  { %v185_v57 = vmul.f32 %v177_v51, %v163_v43  ;;  %v219_v58 = vadd.f32 %v217_v47, %v177_v51  ;;  %v168_v59 = vadd.f32 %v167_v49, %v166_v52  ;;  %v127_v8 = vmul.f32 %v534_v6, %v526_v2  ;;  %v212_v50 = vld [vmem:[#allocation8 + $0x2] sm:$0x3] }
  0x1e   :  { %v182_v61 = vadd.f32 %v181_v54, %v180_v56  ;;  %v135_v16 = vsel %vm134_vm0, %v126_v7, 0.0  ;;  %v128_v1 = vmul.f32 %v542_v10, %v528_v3  ;;  %v296_v5 = vadd.f32 -1.0, %v223_v12 }
  0x1f   :  { %v187_v62 = vmax.f32 %v185_v57, 1e-12  ;;  %221 = vst [vmem:[#allocation9] sm:$0x3] %v219_v58  ;;  %v170_v63 = vadd.f32 %v169_v55, %v168_v59  ;;  %v136_v17 = vsel %vm134_vm0, %v127_v8, 0.0  ;;  %v297_v21 = vadd.f32 -1.0, %v224_v13 }
  0x20   :  { %v184_v9 = vadd.f32 %v183_v60, %v182_v61  ;;  %v130_v2 = vmul.f32 %v114_v33, %v558_v19  ;;  %v131_v6 = vmul.f32 %v115_v34, %v560_v20  ;;  %v227_v22 = vmul.f32 %v296_v5, %v296_v5 }
  0x21   :  { %309 = vrsqrt.f32 %v187_v62  ;;  %v228_v23 = vmul.f32 %v297_v21, %v297_v21  ;;  %v129_v10 = vmul.f32 %v544_v11, %v530_v4  ;;  %v137_v19 = vadd.f32 %v136_v17, %v135_v16 }
  0x22   :  { %v186_v14 = vmul.f32 %v184_v9, %v170_v63  ;;  %v220_v15 = vadd.f32 %v218_v0, %v184_v9  ;;  %v138_v20 = vsel %vm134_vm0, %v128_v1, 0.0  ;;  %v132_v26 = vmul.f32 %v574_v35, %v565_v25  ;;  %233 = vst [vmem:[#allocation11] sm:$0xff] %v227_v22 }
  0x23   :  { %v142_v27 = vsel %vm134_vm0, %v130_v2, 0.0  ;;  %v143_v28 = vsel %vm134_vm0, %v131_v6, 0.0  ;;  %v139_v31 = vadd.f32 %v138_v20, %v137_v19  ;;  %v140_v32 = vsel %vm134_vm0, %v129_v10, 0.0  ;;  %234 = vst [vmem:[#allocation11 + $0x8] sm:$0xff] %v228_v23 }
  0x24   :  { %v188_v18 = vmax.f32 %v186_v14, 1e-12  ;;  %222 = vst [vmem:[#allocation9 + $0x2] sm:$0x3] %v220_v15  ;;  %vm195_vm1 = vweird.f32 %v187_v62  ;;  %v144_v33 = vadd.f32 %v143_v28, %v142_v27  ;;  %v133_v34 = vmul.f32 %v580_v38, %v570_v29 }
  0x25   :  { %260 = dma.vmem_to_hbm [thread:$0]  %s253_s10, 64, %s255_s13, [#allocation10], %s466_s26, %s466_s26, %s467_s27   ;;  %v145_v35 = vsel %vm134_vm0, %v132_v26, 0.0  ;;  %v141_v37 = vadd.f32 %v140_v32, %v139_v31 }
  0x26   :  { %311 = vrsqrt.f32 %v188_v18  ;;  %273 = dma.vmem_to_hbm [thread:$0]  %s266_s14, 256, %s268_s17, [#allocation10], %s470_s8, %s470_s8, %s471_s9   ;;  %v146_v41 = vadd.f32 %v145_v35, %v144_v33  ;;  %v147_v42 = vsel %vm134_vm0, %v133_v34, 0.0  ;;  %vm205_vm4 = vweird.f32 %v188_v18 }
  0x27   :  { %v310_v3 = vpop.eup %309 }
  0x28   :  { %v190_v24 = vmul.f32 %v310_v3, %v187_v62  ;;  %vm196_vm2 = vweird.f32 %v310_v3  ;;  %v148_v48 = vadd.f32 %v147_v42, %v146_v41 }
  0x29   :  { %vm197_vm3 = vmor %vm195_vm1, %vm196_vm2 }
  0x2a   :  { %v191_v30 = vmul.f32 %v310_v3, %v190_v24 }
  0x2c   :  { %v312_v4 = vpop.eup %311  ;;  %v192_v11 = vmul.f32 0.5, %v191_v30 }
  0x2d   :  { %v200_v25 = vmul.f32 %v312_v4, %v188_v18  ;;  %vm206_vm5 = vweird.f32 %v312_v4 }
  0x2e   :  { %v193_v36 = vsub.f32 1.5, %v192_v11  ;;  %vm207_vm6 = vmor %vm205_vm4, %vm206_vm5 }
  0x2f   :  { %v201_v39 = vmul.f32 %v312_v4, %v200_v25 }
  0x30   :  { %v194_v40 = vmul.f32 %v310_v3, %v193_v36 }
  0x31   :  { %v202_v43 = vmul.f32 0.5, %v201_v39 }
  0x32   :  { %v198_v44 = vsel %vm197_vm3, %v310_v3, %v194_v40 }
  0x33   :  { %v209_v46 = vmul.f32 %v198_v44, %v141_v37  ;;  %v203_v47 = vsub.f32 1.5, %v202_v43 }
  0x35   :  { %v213_v29 = vadd.f32 %v211_v45, %v209_v46  ;;  %v204_v38 = vmul.f32 %v312_v4, %v203_v47 }
  0x37   :  { %215 = vst [vmem:[#allocation8] sm:$0x3] %v213_v29  ;;  %v208_v49 = vsel %vm207_vm6, %v312_v4, %v204_v38 }
  0x38   :  { %v210_v51 = vmul.f32 %v208_v49, %v148_v48 }
  0x3a   :  { %v214_v52 = vadd.f32 %v212_v50, %v210_v51 }
  0x3c   :  { %216 = vst [vmem:[#allocation8 + $0x2] sm:$0x3] %v214_v52 }
  0x3d   :  { %247 = dma.vmem_to_hbm [thread:$0]  %s240_s18, 64, %s242_s21, [#allocation4], %s466_s26, %s466_s26, %s467_s27  }
  0x3e   :  { %461 = dma.done.wait [#allocation4], 64  }
  0x3f   :  { %462 = vsyncadd [#allocation4], 4294967232 }
  0x40   :  { %463 = dma.done.wait [#allocation10], 320  }
  0x41   :  { %464 = vsyncadd [#allocation10], 4294966976 }
  0x42   :  { %286 = vsyncpa [#allocation3], 1 }
  0x43   :  { %287 = vsyncpa [#allocation6], 1 }
  0x44   :  { %288 = vsyncpa [#allocation4], 1 }
  0x45   :  { %289 = vsyncpa [#allocation10], 1 }

</bundles_post_ra>
